<compile_context>
chip_gen: v7x
topology: tpu7x:2x2x1
jax: 0.10.0
libtpu: 0.0.40
codegen_flags: <defaults>
</compile_context>

<pallas_src>
import functools

import jax
import jax.numpy as jnp
from jax.experimental import pallas as pl
from jax.experimental.pallas import tpu as pltpu

_HIGH = jax.lax.Precision.HIGHEST


def _round_up(x, m):
    return ((x + m - 1) // m) * m


# ------------------------------ fused kernel -------------------------------

def _fused_rnn_classifier_kernel(seq_ref, pbuf_ref, out_ref, gx_ref, *,
                                 B, B_pad, S, W,
                                 o_whh, o_htoo, o_bc, o_hb, nonlinearity):
    f32 = jnp.float32
    Dp = seq_ref.shape[1]

    if nonlinearity == "tanh":
        act = jnp.tanh
    else:                                      # nn.RNN(nonlinearity='relu')
        act = lambda v: jnp.maximum(v, 0.0)

    # ---- static slices of the single packed parameter buffer ---------------
    w_comb = pbuf_ref[0:Dp, :]                 # (Dp, W)  itoh folded into W_ih
    whh    = pbuf_ref[o_whh:o_whh + W, :]      # (W, W)   zero-padded past H
    htoo_w = pbuf_ref[o_htoo:o_htoo + W, :]    # (W, W)   zero-padded past H/O
    b_comb = pbuf_ref[o_bc:o_bc + 1, :]        # (1, W)
    htoo_b = pbuf_ref[o_hb:o_hb + 1, :]        # (1, W)

    # ---- input-side contribution for ALL timesteps: one big MXU matmul -----
    # seq is already time-major (S*B_pad, Dp); gx lands time-major in VMEM so
    # each per-step read below is a pure (8-aligned) address offset.
    gx_ref[...] = (jnp.dot(seq_ref[...], w_comb,
                           preferred_element_type=f32, precision=_HIGH)
                   + b_comb)                                       # (S*B_pad, W)

    # ---- recurrence: fully unrolled (S static & small). Critical path per
    #      step: one (B_pad,W)x(W,W) MXU op + add + tanh (EUP). --------------
    h = act(gx_ref[0:B_pad, :])                # h0 = 0  =>  step 0 has no h@Whh
    for t in range(1, S):
        xt = gx_ref[t * B_pad:(t + 1) * B_pad, :]
        h = act(xt + jnp.dot(h, whh, preferred_element_type=f32,
                             precision=_HIGH))

    # ---- htoo linear (dropout p=0.0 -> identity) ----------------------------
    logits = (jnp.dot(h, htoo_w, preferred_element_type=f32, precision=_HIGH)
              + htoo_b)                                            # (B_pad, W)

    # ---- LogSoftmax(dim=1): on (1,B,O) dim 1 is the *batch* axis, so this is
    #      a normalization over rows. Padded batch rows are masked out. -------
    row = jax.lax.broadcasted_iota(jnp.int32, (B_pad, W), 0)
    valid = row < B
    masked = jnp.where(valid, logits, -1e30)
    mx = jnp.max(masked, axis=0, keepdims=True)
    se = jnp.sum(jnp.exp(masked - mx), axis=0, keepdims=True)
    out_ref[...] = logits - mx - jnp.log(se)


# ------------------------ parameter fold + packing --------------------------

def pack_params(params):
    """Fold itoh into the RNN input projection and pack everything into one
    lane-padded f32 buffer with 8-aligned row sections (one DMA)."""
    itoh_w = params["itoh_w_t"].astype(jnp.float32)   # (D, H)
    itoh_b = params["itoh_b"].astype(jnp.float32)     # (1, H)
    wih    = params["wih_t"].astype(jnp.float32)      # (H, H)
    whh    = params["whh_t"].astype(jnp.float32)      # (H, H)
    rnn_b  = params["rnn_b"].astype(jnp.float32)      # (1, H)
    htoo_w = params["htoo_w_t"].astype(jnp.float32)   # (H, O)
    htoo_b = params["htoo_b"].astype(jnp.float32)     # (1, O)

    D, H = itoh_w.shape
    O = htoo_w.shape[1]
    W = max(H, O)                      # common lane width of packed sections
    Dp = _round_up(D, 8)
    Wp = _round_up(W, 8)

    # exact algebra:  (x @ Wi + bi) @ Wih + b  ==  x @ (Wi@Wih) + (bi@Wih + b)
    w_comb = jnp.dot(itoh_w, wih, precision=_HIGH)            # (D, H)
    b_comb = jnp.dot(itoh_b, wih, precision=_HIGH) + rnn_b    # (1, H)

    o_whh = Dp
    o_htoo = Dp + Wp
    o_bc = Dp + 2 * Wp
    o_hb = o_bc + 8
    rows = o_bc + 16

    pbuf = jnp.zeros((rows, W), jnp.float32)
    pbuf = pbuf.at[0:D, 0:H].set(w_comb)
    pbuf = pbuf.at[o_whh:o_whh + H, 0:H].set(whh)
    pbuf = pbuf.at[o_htoo:o_htoo + H, 0:O].set(htoo_w)
    pbuf = pbuf.at[o_bc, 0:H].set(b_comb[0])
    pbuf = pbuf.at[o_hb, 0:O].set(htoo_b[0])

    meta = dict(D=D, Dp=Dp, H=H, O=O, W=W,
                o_whh=o_whh, o_htoo=o_htoo, o_bc=o_bc, o_hb=o_hb)
    return pbuf, meta


# --------------------------------- wrapper ----------------------------------

def rnn_classifier_forward(params, sequence, *, batch_first=True,
                           nonlinearity="tanh"):
    if not batch_first:
        sequence = jnp.transpose(sequence, (1, 0, 2))
    seq = sequence.astype(jnp.float32)                         # (B, S, D)
    B, S, D = seq.shape

    # In production pack_params would be done once; it is tiny here.
    pbuf, m = pack_params(params)
    Dp, O, W = m["Dp"], m["O"], m["W"]
    B_pad = max(8, _round_up(B, 8))                            # full sublane tile

    # Wrapper-side layout work (cheap XLA ops in HBM): pad batch/feature dims,
    # go time-major, flatten -> the kernel DMA is one plain rectangular copy.
    seq = jnp.pad(seq, ((0, B_pad - B), (0, 0), (0, Dp - D)))
    seq_tm = jnp.transpose(seq, (1, 0, 2)).reshape(S * B_pad, Dp)

    kernel = functools.partial(
        _fused_rnn_classifier_kernel,
        B=B, B_pad=B_pad, S=S, W=W,
        o_whh=m["o_whh"], o_htoo=m["o_htoo"], o_bc=m["o_bc"], o_hb=m["o_hb"],
        nonlinearity=nonlinearity)

    def full(shape):
        return pl.BlockSpec(shape, lambda i, n=len(shape): (0,) * n)

    # NOTE: a v7x two-core batch split (extra "parallel" grid axis) is NOT
    # added because the module's LogSoftmax couples outputs across the batch.
    out_pad = pl.pallas_call(
        kernel,
        out_shape=jax.ShapeDtypeStruct((B_pad, W), jnp.float32),
        grid=(1,),
        in_specs=[full(seq_tm.shape), full(pbuf.shape)],
        out_specs=full((B_pad, W)),
        scratch_shapes=[pltpu.VMEM((S * B_pad, W), jnp.float32)],
        compiler_params=pltpu.CompilerParams(
            dimension_semantics=("arbitrary",)),
    )(seq_tm, pbuf)

    return out_pad[:B, :O]


# ------------------------------- parameters ---------------------------------

def init_params(key, input_dim, hidden_dim, output_dim):
    """Deterministic synthetic parameters (PyTorch-equivalent shapes,
    weights stored transposed so the math is x @ W_t)."""
    def uniform(k, shape, fan_in):
        s = 1.0 / jnp.sqrt(float(fan_in))
        return jax.random.uniform(k, shape, jnp.float32, -s, s)

    k = jax.random.split(key, 8)
    return {
        # itoh: nn.Linear(input_dim, hidden_dim)
        "itoh_w_t": uniform(k[0], (input_dim, hidden_dim), input_dim),
        "itoh_b":   uniform(k[1], (1, hidden_dim), input_dim),
        # nn.RNN(hidden_dim, hidden_dim), single layer
        "wih_t":    uniform(k[2], (hidden_dim, hidden_dim), hidden_dim),
        "whh_t":    uniform(k[3], (hidden_dim, hidden_dim), hidden_dim),
        # combined bias b_ih + b_hh (mathematically equivalent)
        "rnn_b":    (uniform(k[4], (1, hidden_dim), hidden_dim)
                     + uniform(k[5], (1, hidden_dim), hidden_dim)),
        # htoo: nn.Linear(hidden_dim, output_dim)
        "htoo_w_t": uniform(k[6], (hidden_dim, output_dim), hidden_dim),
        "htoo_b":   uniform(k[7], (1, output_dim), hidden_dim),
    }


# -------------------------- pure-JAX reference check ------------------------

def ref_forward(params, sequence, *, batch_first=True, nonlinearity="tanh"):
    """Unfused reference following the PyTorch module step by step."""
    if not batch_first:
        sequence = jnp.transpose(sequence, (1, 0, 2))
    x = sequence.astype(jnp.float32)
    emb = (jnp.einsum("bsd,dh->bsh", x, params["itoh_w_t"], precision=_HIGH)
           + params["itoh_b"])                                   # (B, S, H)
    act = jnp.tanh if nonlinearity == "tanh" else jax.nn.relu
    B = emb.shape[0]
    H = params["whh_t"].shape[0]

    def step(h, x_t):
        h = act(jnp.dot(x_t, params["wih_t"], precision=_HIGH)
                + jnp.dot(h, params["whh_t"], precision=_HIGH)
                + params["rnn_b"][0])
        return h, None

    h0 = jnp.zeros((B, H), jnp.float32)
    h_last, _ = jax.lax.scan(step, h0, jnp.transpose(emb, (1, 0, 2)))
    logits = (jnp.dot(h_last, params["htoo_w_t"], precision=_HIGH)
              + params["htoo_b"])                                # (B, O)
    # LogSoftmax(dim=1) on (1,B,O) then squeeze(0) == log_softmax over batch.
    return jax.nn.log_softmax(logits, axis=0)


# ----------------------------------- main -----------------------------------

if __name__ == "__main__":
    input_dim, hidden_dim, output_dim = 16, 32, 4
    B, S = 2, 8

    key = jax.random.PRNGKey(0)
    pkey, xkey = jax.random.split(key)
    params = init_params(pkey, input_dim, hidden_dim, output_dim)
    sequence = jax.random.normal(xkey, (B, S, input_dim), jnp.float32)

    out = rnn_classifier_forward(params, sequence)
    out = jax.block_until_ready(out)

    ref = ref_forward(params, sequence)
    assert out.shape == ref.shape == (B, output_dim), (out.shape, ref.shape)
    assert bool(jnp.allclose(out, ref, atol=1e-4, rtol=1e-4)), \
        "Pallas output mismatch vs pure-JAX reference"

    # NOTE: LogSoftmax(dim=1) normalizes over the *batch* axis, exactly as the
    # quoted PyTorch module does (likely a bug in the original model).
    print("KERNEL_OK")
</pallas_src>

<mosaic_0001>
module attributes {stable_mosaic.version = 11 : i64} {
  func.func @_fused_rnn_classifier_kernel(%arg0: i32, %arg1: memref<64x16xf32, #tpu.memory_space<vmem>>, %arg2: memref<96x32xf32, #tpu.memory_space<vmem>>, %arg3: memref<8x32xf32, #tpu.memory_space<vmem>>, %arg4: memref<64x32xf32, #tpu.memory_space<vmem>>) attributes {dimension_semantics = [#tpu.dimension_semantics<arbitrary>], iteration_bounds = array<i64: 1>, scalar_prefetch = 0 : i64, scratch_operands = 1 : i64, tpu.core_type = #tpu.core_type<tc>, window_params = [{pipeline_mode = #tpu.pipeline_mode<synchronous>, transform_indices = @transform_0, window_bounds = array<i64: 64, 16>}, {pipeline_mode = #tpu.pipeline_mode<synchronous>, transform_indices = @transform_1, window_bounds = array<i64: 96, 32>}, {pipeline_mode = #tpu.pipeline_mode<synchronous>, transform_indices = @transform_2, window_bounds = array<i64: 8, 32>}]} {
    %c0 = arith.constant 0 : index
    %c0_0 = arith.constant 0 : index
    %0 = vector.load %arg2[%c0, %c0_0] : memref<96x32xf32, #tpu.memory_space<vmem>>, vector<16x32xf32>
    %c16 = arith.constant 16 : index
    %c0_1 = arith.constant 0 : index
    %1 = vector.load %arg2[%c16, %c0_1] : memref<96x32xf32, #tpu.memory_space<vmem>>, vector<32x32xf32>
    %c48 = arith.constant 48 : index
    %c0_2 = arith.constant 0 : index
    %2 = vector.load %arg2[%c48, %c0_2] : memref<96x32xf32, #tpu.memory_space<vmem>>, vector<32x32xf32>
    %c80 = arith.constant 80 : index
    %c0_3 = arith.constant 0 : index
    %3 = vector.load %arg2[%c80, %c0_3] : memref<96x32xf32, #tpu.memory_space<vmem>>, vector<1x32xf32>
    %c88 = arith.constant 88 : index
    %c0_4 = arith.constant 0 : index
    %4 = vector.load %arg2[%c88, %c0_4] : memref<96x32xf32, #tpu.memory_space<vmem>>, vector<1x32xf32>
    %c0_5 = arith.constant 0 : index
    %c0_6 = arith.constant 0 : index
    %5 = vector.load %arg1[%c0_5, %c0_6] : memref<64x16xf32, #tpu.memory_space<vmem>>, vector<64x16xf32>
    %cst = arith.constant dense<0.000000e+00> : vector<64x32xf32>
    %6 = tpu.matmul %5, %0, %cst {dimension_numbers = #tpu.dot_dimension_numbers<[1], [0], [0], [1], [0, 0, 1, 1], [], []>, precision = #tpu.contract_precision<fp32>} : vector<64x16xf32>, vector<16x32xf32>, vector<64x32xf32> -> vector<64x32xf32>
    %7 = vector.broadcast %3 : vector<1x32xf32> to vector<64x32xf32>
    %8 = arith.addf %6, %7 : vector<64x32xf32>
    %c0_7 = arith.constant 0 : index
    %c0_8 = arith.constant 0 : index
    %9 = vector.load %arg4[%c0_7, %c0_8] : memref<64x32xf32, #tpu.memory_space<vmem>>, vector<64x32xf32>
    tpu.vector_store %arg4[%c0_7, %c0_8], %8 {strides = array<i32>} : memref<64x32xf32, #tpu.memory_space<vmem>>, vector<64x32xf32>,
    %c0_9 = arith.constant 0 : index
    %c0_10 = arith.constant 0 : index
    %10 = vector.load %arg4[%c0_9, %c0_10] : memref<64x32xf32, #tpu.memory_space<vmem>>, vector<8x32xf32>
    %11 = math.tanh %10 : vector<8x32xf32>
    %c8 = arith.constant 8 : index
    %c0_11 = arith.constant 0 : index
    %12 = vector.load %arg4[%c8, %c0_11] : memref<64x32xf32, #tpu.memory_space<vmem>>, vector<8x32xf32>
    %cst_12 = arith.constant dense<0.000000e+00> : vector<8x32xf32>
    %13 = tpu.matmul %11, %1, %cst_12 {dimension_numbers = #tpu.dot_dimension_numbers<[1], [0], [0], [1], [0, 0, 1, 1], [], []>, precision = #tpu.contract_precision<fp32>} : vector<8x32xf32>, vector<32x32xf32>, vector<8x32xf32> -> vector<8x32xf32>
    %14 = arith.addf %12, %13 : vector<8x32xf32>
    %15 = math.tanh %14 : vector<8x32xf32>
    %c16_13 = arith.constant 16 : index
    %c0_14 = arith.constant 0 : index
    %16 = vector.load %arg4[%c16_13, %c0_14] : memref<64x32xf32, #tpu.memory_space<vmem>>, vector<8x32xf32>
    %cst_15 = arith.constant dense<0.000000e+00> : vector<8x32xf32>
    %17 = tpu.matmul %15, %1, %cst_15 {dimension_numbers = #tpu.dot_dimension_numbers<[1], [0], [0], [1], [0, 0, 1, 1], [], []>, precision = #tpu.contract_precision<fp32>} : vector<8x32xf32>, vector<32x32xf32>, vector<8x32xf32> -> vector<8x32xf32>
    %18 = arith.addf %16, %17 : vector<8x32xf32>
    %19 = math.tanh %18 : vector<8x32xf32>
    %c24 = arith.constant 24 : index
    %c0_16 = arith.constant 0 : index
    %20 = vector.load %arg4[%c24, %c0_16] : memref<64x32xf32, #tpu.memory_space<vmem>>, vector<8x32xf32>
    %cst_17 = arith.constant dense<0.000000e+00> : vector<8x32xf32>
    %21 = tpu.matmul %19, %1, %cst_17 {dimension_numbers = #tpu.dot_dimension_numbers<[1], [0], [0], [1], [0, 0, 1, 1], [], []>, precision = #tpu.contract_precision<fp32>} : vector<8x32xf32>, vector<32x32xf32>, vector<8x32xf32> -> vector<8x32xf32>
    %22 = arith.addf %20, %21 : vector<8x32xf32>
    %23 = math.tanh %22 : vector<8x32xf32>
    %c32 = arith.constant 32 : index
    %c0_18 = arith.constant 0 : index
    %24 = vector.load %arg4[%c32, %c0_18] : memref<64x32xf32, #tpu.memory_space<vmem>>, vector<8x32xf32>
    %cst_19 = arith.constant dense<0.000000e+00> : vector<8x32xf32>
    %25 = tpu.matmul %23, %1, %cst_19 {dimension_numbers = #tpu.dot_dimension_numbers<[1], [0], [0], [1], [0, 0, 1, 1], [], []>, precision = #tpu.contract_precision<fp32>} : vector<8x32xf32>, vector<32x32xf32>, vector<8x32xf32> -> vector<8x32xf32>
    %26 = arith.addf %24, %25 : vector<8x32xf32>
    %27 = math.tanh %26 : vector<8x32xf32>
    %c40 = arith.constant 40 : index
    %c0_20 = arith.constant 0 : index
    %28 = vector.load %arg4[%c40, %c0_20] : memref<64x32xf32, #tpu.memory_space<vmem>>, vector<8x32xf32>
    %cst_21 = arith.constant dense<0.000000e+00> : vector<8x32xf32>
    %29 = tpu.matmul %27, %1, %cst_21 {dimension_numbers = #tpu.dot_dimension_numbers<[1], [0], [0], [1], [0, 0, 1, 1], [], []>, precision = #tpu.contract_precision<fp32>} : vector<8x32xf32>, vector<32x32xf32>, vector<8x32xf32> -> vector<8x32xf32>
    %30 = arith.addf %28, %29 : vector<8x32xf32>
    %31 = math.tanh %30 : vector<8x32xf32>
    %c48_22 = arith.constant 48 : index
    %c0_23 = arith.constant 0 : index
    %32 = vector.load %arg4[%c48_22, %c0_23] : memref<64x32xf32, #tpu.memory_space<vmem>>, vector<8x32xf32>
    %cst_24 = arith.constant dense<0.000000e+00> : vector<8x32xf32>
    %33 = tpu.matmul %31, %1, %cst_24 {dimension_numbers = #tpu.dot_dimension_numbers<[1], [0], [0], [1], [0, 0, 1, 1], [], []>, precision = #tpu.contract_precision<fp32>} : vector<8x32xf32>, vector<32x32xf32>, vector<8x32xf32> -> vector<8x32xf32>
    %34 = arith.addf %32, %33 : vector<8x32xf32>
    %35 = math.tanh %34 : vector<8x32xf32>
    %c56 = arith.constant 56 : index
    %c0_25 = arith.constant 0 : index
    %36 = vector.load %arg4[%c56, %c0_25] : memref<64x32xf32, #tpu.memory_space<vmem>>, vector<8x32xf32>
    %cst_26 = arith.constant dense<0.000000e+00> : vector<8x32xf32>
    %37 = tpu.matmul %35, %1, %cst_26 {dimension_numbers = #tpu.dot_dimension_numbers<[1], [0], [0], [1], [0, 0, 1, 1], [], []>, precision = #tpu.contract_precision<fp32>} : vector<8x32xf32>, vector<32x32xf32>, vector<8x32xf32> -> vector<8x32xf32>
    %38 = arith.addf %36, %37 : vector<8x32xf32>
    %39 = math.tanh %38 : vector<8x32xf32>
    %cst_27 = arith.constant dense<0.000000e+00> : vector<8x32xf32>
    %40 = tpu.matmul %39, %2, %cst_27 {dimension_numbers = #tpu.dot_dimension_numbers<[1], [0], [0], [1], [0, 0, 1, 1], [], []>, precision = #tpu.contract_precision<fp32>} : vector<8x32xf32>, vector<32x32xf32>, vector<8x32xf32> -> vector<8x32xf32>
    %41 = vector.broadcast %4 : vector<1x32xf32> to vector<8x32xf32>
    %42 = arith.addf %40, %41 : vector<8x32xf32>
    %43 = tpu.iota {dimensions = array<i32: 0>} : vector<8x32xi32>
    %c2_i32 = arith.constant 2 : i32
    %44 = vector.broadcast %c2_i32 : i32 to vector<8x32xi32>
    %45 = arith.cmpi slt, %43, %44 : vector<8x32xi32>
    %cst_28 = arith.constant -1.000000e+30 : f32
    %46 = vector.broadcast %cst_28 : f32 to vector<8x32xf32>
    %47 = arith.select %45, %42, %46 : vector<8x32xi1>, vector<8x32xf32>
    %cst_29 = arith.constant dense<0xFF800000> : vector<32xf32>
    %48 = vector.multi_reduction <maximumf>, %47, %cst_29 [0] : vector<8x32xf32> to vector<32xf32>
    %49 = vector.shape_cast %48 : vector<32xf32> to vector<1x32xf32>
    %50 = vector.broadcast %49 : vector<1x32xf32> to vector<8x32xf32>
    %51 = arith.subf %47, %50 : vector<8x32xf32>
    %52 = math.exp %51 : vector<8x32xf32>
    %cst_30 = arith.constant dense<0.000000e+00> : vector<32xf32>
    %53 = vector.multi_reduction <add>, %52, %cst_30 [0] : vector<8x32xf32> to vector<32xf32>
    %54 = vector.shape_cast %53 : vector<32xf32> to vector<1x32xf32>
    %55 = vector.broadcast %49 : vector<1x32xf32> to vector<8x32xf32>
    %56 = arith.subf %42, %55 : vector<8x32xf32>
    %57 = math.log %54 : vector<1x32xf32>
    %58 = vector.broadcast %57 : vector<1x32xf32> to vector<8x32xf32>
    %59 = arith.subf %56, %58 : vector<8x32xf32>
    %c0_31 = arith.constant 0 : index
    %c0_32 = arith.constant 0 : index
    %60 = vector.load %arg3[%c0_31, %c0_32] : memref<8x32xf32, #tpu.memory_space<vmem>>, vector<8x32xf32>
    tpu.vector_store %arg3[%c0_31, %c0_32], %59 {strides = array<i32>} : memref<8x32xf32, #tpu.memory_space<vmem>>, vector<8x32xf32>,
    return
  }
  func.func @transform_0(%arg0: i32) -> (i32, i32) {
    %c0_i32 = arith.constant 0 : i32
    %c0_i32_0 = arith.constant 0 : i32
    %c0_i32_1 = arith.constant 0 : i32
    return %c0_i32, %c0_i32_0 : i32, i32
  }
  func.func @transform_1(%arg0: i32) -> (i32, i32) {
    %c0_i32 = arith.constant 0 : i32
    %c0_i32_0 = arith.constant 0 : i32
    %c0_i32_1 = arith.constant 0 : i32
    return %c0_i32, %c0_i32_0 : i32, i32
  }
  func.func @transform_2(%arg0: i32) -> (i32, i32) {
    %c0_i32 = arith.constant 0 : i32
    %c0_i32_0 = arith.constant 0 : i32
    %c0_i32_1 = arith.constant 0 : i32
    return %c0_i32, %c0_i32_0 : i32, i32
  }
}

</mosaic_0001>

<bundles_post_ra>
// kernel: tpu_custom_call.1
= control target key start
LH: loop header
LB: loop body
LE: loop exit
PB: predicated region body
PF: predicated region fallthrough
CT: control target
= control target key end

     0   :  { %vm36_vm0 = vcmask 130048   ;;  %s6667_s0 = inlined_call_operand.vmem [shape: f32[64,16], index: 0, kind: input, shape index: {}]   ;;  %s6668_s1 = inlined_call_operand.vmem [shape: f32[96,32], index: 1, kind: input, shape index: {}]   ;;  %s6669_s2 = inlined_call_operand.hbm [shape: f32[8,32], index: 2, kind: output, shape index: {}]  }
   0x1   :  { %v12_v0 = vld [vmem:[%s6668_s1] sm:$0xff]  ;;  %v13_v1 = vld [vmem:[%s6668_s1 + $0x8] sm:$0xff]  ;;  %v26_v7 = vld [vmem:[%s6667_s0 + $0x10] sm:$0xff] }
   0x2   :  { %v24_v2 = vld [vmem:[%s6667_s0] sm:$0xff]  ;;  %v62_v3 = vand.u32 4294901760, %v12_v0  ;;  %v65_v4 = vand.u32 4294901760, %v13_v1  ;;  %v25_v6 = vld [vmem:[%s6667_s0 + $0x8] sm:$0xff]  ;;  %v27_v8 = vld [vmem:[%s6667_s0 + $0x18] sm:$0xff]  ;;  %v44_v14 = vsel %vm36_vm0, %v26_v7, 0 }
   0x3   :  { %v38_v5 = vsel %vm36_vm0, %v24_v2, 0  ;;  %v28_v10 = vld [vmem:[%s6667_s0 + $0x20] sm:$0xff]  ;;  %v41_v13 = vsel %vm36_vm0, %v25_v6, 0  ;;  %v29_v15 = vld [vmem:[%s6667_s0 + $0x28] sm:$0xff] }
   0x4   :  { %v6186_v9 = vand.u32 4294901760, %v38_v5  ;;  %v6191_v11 = vsub.f32 %v12_v0, %v62_v3  ;;  %v6193_v12 = vsub.f32 %v13_v1, %v65_v4 }
   0x5   :  { %7 = vsyncpa [#allocation4], 0  ;;  %v47_v16 = vsel %vm36_vm0, %v27_v8, 0  ;;  %v6202_v17 = vpack.c.bf16 %v65_v4, %v62_v3  ;;  %v50_v18 = vsel %vm36_vm0, %v28_v10, 0  ;;  %v30_v21 = vld [vmem:[%s6667_s0 + $0x30] sm:$0xff]  ;;  %v6210_v22 = vand.u32 4294901760, %v41_v13 }
   0x6   :  { %5123 = vmatprep.mubr.f32.mxu0 %v6186_v9  ;;  %v211_v19 = vand.u32 4294901760, %v6191_v11  ;;  %v218_v20 = vand.u32 4294901760, %v6193_v12  ;;  %v6212_v23 = vand.u32 4294901760, %v44_v14  ;;  %v6214_v24 = vand.u32 4294901760, %v50_v18  ;;  %v31_v30 = vld [vmem:[%s6667_s0 + $0x38] sm:$0xff]  ;;  %v14_v8 = vld [vmem:[%s6668_s1 + $0x10] sm:$0xff] }
   0x7   :  { %v53_v25 = vsel %vm36_vm0, %v29_v15, 0  ;;  %5728 = vmatprep.subr.bf16.mxu1 %v6202_v17  ;;  %v6224_v28 = vand.u32 4294901760, %v47_v16  ;;  %v6227_v29 = vsub.f32 %v38_v5, %v6186_v9  ;;  %v6234_v31 = vsub.f32 %v41_v13, %v6210_v22  ;;  %v16_v10 = vld [vmem:[%s6668_s1 + $0x20] sm:$0xff] }
   0x8   :  { %v212_v26 = vsub.f32 %v6191_v11, %v211_v19  ;;  %v219_v27 = vsub.f32 %v6193_v12, %v218_v20  ;;  %5730 = vmatpush3.bf16.msra.mxu1 %v6202_v17  ;;  %v5735_v32 = vpack.c.bf16 %v6193_v12, %v6191_v11  ;;  %v6239_v33 = vsub.f32 %v44_v14, %v6212_v23  ;;  %v17_v14 = vld [vmem:[%s6668_s1 + $0x28] sm:$0xff] }
   0x9   :  { %v56_v34 = vsel %vm36_vm0, %v30_v21, 0  ;;  %v6243_v37 = vsub.f32 %v47_v16, %v6224_v28  ;;  %v6245_v38 = vand.u32 4294901760, %v53_v25  ;;  %v6248_v39 = vsub.f32 %v50_v18, %v6214_v24 }
   0xa   :  { %v213_v35 = vand.u32 4294901760, %v212_v26  ;;  %v220_v36 = vand.u32 4294901760, %v219_v27  ;;  %v59_v40 = vsel %vm36_vm0, %v31_v30, 0  ;;  %v130_v41 = vand.u32 4294901760, %v6227_v29 }
   0xb   :  { %v140_v42 = vand.u32 4294901760, %v6234_v31  ;;  %v6253_v44 = vand.u32 4294901760, %v56_v34  ;;  %v150_v45 = vand.u32 4294901760, %v6239_v33  ;;  %v160_v46 = vand.u32 4294901760, %v6243_v37 }
   0xc   :  { %v5731_v43 = vpack.c.bf16 %v220_v36, %v213_v35  ;;  %v170_v47 = vand.u32 4294901760, %v6248_v39  ;;  %v131_v48 = vsub.f32 %v6227_v29, %v130_v41  ;;  %v179_v50 = vsub.f32 %v53_v25, %v6245_v38 }
   0xd   :  { %v141_v49 = vsub.f32 %v6234_v31, %v140_v42  ;;  %v6261_v51 = vand.u32 4294901760, %v59_v40  ;;  %v151_v52 = vsub.f32 %v6239_v33, %v150_v45  ;;  %v161_v53 = vsub.f32 %v6243_v37, %v160_v46 }
   0xe   :  { %5732 = vmatprep.subr.bf16.mxu0 %v5731_v43  ;;  %6039 = vmatprep.subr.bf16.mxu1 %v5731_v43  ;;  %v132_v54 = vand.u32 4294901760, %v131_v48  ;;  %v171_v56 = vsub.f32 %v6248_v39, %v170_v47  ;;  %v189_v57 = vsub.f32 %v56_v34, %v6253_v44  ;;  %v180_v58 = vand.u32 4294901760, %v179_v50 }
   0xf   :  { %5734 = vmatpush3.bf16.msra.mxu0 %v5731_v43  ;;  %v142_v55 = vand.u32 4294901760, %v141_v49  ;;  %v152_v59 = vand.u32 4294901760, %v151_v52  ;;  %v199_v60 = vsub.f32 %v59_v40, %v6261_v51  ;;  %v162_v62 = vand.u32 4294901760, %v161_v53 }
  0x10   :  { %5736 = vmatprep.subr.bf16.mxu0 %v5735_v32  ;;  %5107 = vmatprep.mubr.f32.mxu1 %v132_v54  ;;  %v190_v61 = vand.u32 4294901760, %v189_v57  ;;  %v181_v63 = vsub.f32 %v179_v50, %v180_v58  ;;  %v172_v0 = vand.u32 4294901760, %v171_v56  ;;  %v5743_v5 = vpack.c.bf16 %v218_v20, %v211_v19 }
  0x11   :  { %5108 = vmatmul.mubr.f32.vlgmr.msra.gmra.mrb[0].mxu1 %v142_v55  ;;  %v200_v1 = vand.u32 4294901760, %v199_v60  ;;  %v6148_v11 = vmov 0.0|0.0   ;;  %v837_v12 = vand.u32 4294901760, %v14_v8  ;;  %v843_v15 = vand.u32 4294901760, %v16_v10 }
  0x12   :  { %5124 = vmatmul.mubr.f32.vlgmr.msra.gmra.mrb[0].mxu0 %v6210_v22  ;;  %5110 = vmatprep.mubr.f32.mxu1 %v152_v59  ;;  %v191_v2 = vsub.f32 %v189_v57, %v190_v61  ;;  %v182_v3 = vand.u32 4294901760, %v181_v63  ;;  %vm6149_vm1 = vmmov 0   ;;  %v6150_v16 = vmov 0.0  }
  0x13   :  { %5738 = vmatpush3.bf16.msra.mxu0 %v5735_v32  ;;  %5126 = vmatprep.mubr.f32.mxu0 %v6212_v23  ;;  %v201_v4 = vsub.f32 %v199_v60, %v200_v1  ;;  %v917_v20 = vsub.f32 %v14_v8, %v837_v12  ;;  %v931_v26 = vsub.f32 %v16_v10, %v843_v15  ;;  %vm821_vm2 = vcmask 261120  }
  0x14   :  { %5740 = vmatprep.subr.bf16.mxu0 %v6202_v17  ;;  %6040 = vmatpush3.bf16.msra.mxu1 %v5731_v43  ;;  %v192_v6 = vand.u32 4294901760, %v191_v2 }
  0x15   :  { %5111 = vmatmul.mubr.f32.gmra.mrb[2].mxu1 %v162_v62  ;;  %v202_v7 = vand.u32 4294901760, %v201_v4  ;;  %5751 = vmatprep.subr.bf16.mxu1 %v6148_v11  ;;  %v932_v30 = vand.u32 4294901760, %v931_v26 }
  0x16   :  { %5127 = vmatmul.mubr.f32.gmra.mrb[2].mxu0 %v6224_v28  ;;  %5113 = vmatprep.mubr.f32.mxu1 %v172_v0 }
  0x17   :  { %5139 = vmatprep.mubr.f32.mxu0 %v6227_v29 }
  0x19   :  { %5114 = vmatmul.mubr.f32.gmra.mrb[4].mxu1 %v182_v3 }
  0x1a   :  { %5140 = vmatmul.mubr.f32.vlgmr.msra.gmra.mrb[0].mxu0 %v6234_v31  ;;  %5116 = vmatprep.mubr.f32.mxu1 %v192_v6 }
  0x1b   :  { %5742 = vmatpush3.bf16.msra.mxu0 %v6202_v17  ;;  %5142 = vmatprep.mubr.f32.mxu0 %v6239_v33  ;;  %v933_v33 = vsub.f32 %v931_v26, %v932_v30 }
  0x1c   :  { %5744 = vmatprep.subr.bf16.mxu0 %v5743_v5 }
  0x1d   :  { %5117 = vmatmul.mubr.f32.gmra.mrb[6].mxu1 %v202_v7  ;;  %v934_v35 = vand.u32 4294901760, %v933_v33 }
  0x1e   :  { %5143 = vmatmul.mubr.f32.gmra.mrb[2].mxu0 %v6243_v37  ;;  %5129 = vmatprep.mubr.f32.mxu1 %v6214_v24 }
  0x1f   :  { %5145 = vmatprep.mubr.f32.mxu0 %v6248_v39 }
  0x21   :  { %5130 = vmatmul.mubr.f32.vlgmr.msra.gmra.mrb[4].mxu1 %v6245_v38 }
  0x22   :  { %5146 = vmatmul.mubr.f32.gmra.mrb[4].mxu0 %v179_v50  ;;  %5132 = vmatprep.mubr.f32.mxu1 %v6253_v44  ;;  %v4801_v50 = vld [vmem:[%s6668_s1 + $0x50] ss:$0 sm:$0xff] }
  0x23   :  { %5148 = vmatprep.mubr.f32.mxu0 %v189_v57 }
  0x25   :  { %5133 = vmatmul.mubr.f32.gmra.mrb[6].mxu1 %v6261_v51 }
  0x26   :  { %5149 = vmatmul.mubr.f32.gmra.mrb[6].mxu0 %v199_v60  ;;  %5207 = vmatprep.mubr.msk.f32.mxu1 %vm6149_vm1, %v6150_v16 }
  0x27   :  { %5155 = vmatprep.mubr.f32.mxu0 %v130_v41 }
  0x2a   :  { %5156 = vmatmul.mubr.f32.vlgmr.msra.gmra.mrb[0].mxu0 %v140_v42 }
  0x2b   :  { %5746 = vmatpush3.bf16.msra.mxu0 %v5743_v5  ;;  %5158 = vmatprep.mubr.f32.mxu0 %v150_v45 }
  0x2c   :  { %5748 = vmatprep.subr.bf16.mxu0 %v6202_v17 }
  0x2e   :  { %5159 = vmatmul.mubr.f32.gmra.mrb[2].mxu0 %v160_v46 }
  0x2f   :  { %5161 = vmatprep.mubr.f32.mxu0 %v170_v47 }
  0x32   :  { %5162 = vmatmul.mubr.f32.gmra.mrb[4].mxu0 %v180_v58 }
  0x33   :  { %5164 = vmatprep.mubr.f32.mxu0 %v190_v61 }
  0x36   :  { %5165 = vmatmul.mubr.f32.gmra.mrb[6].mxu0 %v200_v1 }
  0x37   :  { %5171 = vmatprep.mubr.f32.mxu0 %v6186_v9 }
  0x3a   :  { %5172 = vmatmul.mubr.f32.vlgmr.msra.gmra.mrb[0].mxu0 %v6210_v22 }
  0x3b   :  { %5750 = vmatpush3.bf16.msra.mxu0 %v6202_v17  ;;  %5174 = vmatprep.mubr.f32.mxu0 %v6212_v23  ;;  %v846_v17 = vand.u32 4294901760, %v17_v14 }
  0x3c   :  { %5823 = vmatprep.subr.bf16.mxu0 %v6148_v11 }
  0x3d   :  { %v6325_v19 = vpack.c.bf16 %v846_v17, %v843_v15  ;;  %v938_v27 = vsub.f32 %v17_v14, %v846_v17 }
  0x3e   :  { %5175 = vmatmul.mubr.f32.gmra.mrb[2].mxu0 %v6224_v28 }
  0x3f   :  { %5177 = vmatprep.mubr.f32.mxu0 %v6214_v24  ;;  %v939_v31 = vand.u32 4294901760, %v938_v27  ;;  %v6340_v39 = vpack.c.bf16 %v938_v27, %v931_v26 }
  0x41   :  { %v940_v34 = vsub.f32 %v938_v27, %v939_v31  ;;  %v6344_v41 = vpack.c.bf16 %v939_v31, %v932_v30 }
  0x42   :  { %5178 = vmatmul.mubr.f32.gmra.mrb[4].mxu0 %v6245_v38 }
  0x43   :  { %5180 = vmatprep.mubr.f32.mxu0 %v6253_v44  ;;  %v941_v36 = vand.u32 4294901760, %v940_v34 }
  0x45   :  { %v6336_v37 = vpack.c.bf16 %v941_v36, %v934_v35 }
  0x46   :  { %5181 = vmatmul.mubr.f32.gmra.mrb[6].mxu0 %v6261_v51 }
  0x47   :  { %5187 = vmatprep.mubr.f32.mxu0 %v6186_v9  ;;  %v15_v9 = vld [vmem:[%s6668_s1 + $0x18] sm:$0xff] }
  0x48   :  { %v840_v13 = vand.u32 4294901760, %v15_v9 }
  0x4a   :  { %5188 = vmatmul.mubr.f32.vlgmr.msra.gmra.mrb[0].mxu0 %v6210_v22  ;;  %v6322_v18 = vpack.c.bf16 %v840_v13, %v837_v12  ;;  %v924_v21 = vsub.f32 %v15_v9, %v840_v13  ;;  %v918_v22 = vand.u32 4294901760, %v917_v20 }
  0x4b   :  { %5190 = vmatprep.mubr.f32.mxu0 %v6212_v23 }
  0x4c   :  { %5753 = vmatpush3.bf16.msra.mxu1 %v6322_v18  ;;  %5825 = vmatpush3.bf16.msra.mxu0 %v6322_v18  ;;  %v925_v23 = vand.u32 4294901760, %v924_v21 }
  0x4d   :  { %5754 = vmatprep.subr.bf16.mxu1 %v6148_v11  ;;  %5826 = vmatprep.subr.bf16.mxu0 %v6148_v11 }
  0x4e   :  { %5191 = vmatmul.mubr.f32.gmra.mrb[2].mxu0 %v6224_v28  ;;  %v926_v25 = vsub.f32 %v924_v21, %v925_v23  ;;  %v6342_v40 = vpack.c.bf16 %v925_v23, %v918_v22 }
  0x4f   :  { %5193 = vmatprep.mubr.f32.mxu0 %v6214_v24  ;;  %v919_v24 = vsub.f32 %v917_v20, %v918_v22 }
  0x50   :  { %5756 = vmatpush3.bf16.msra.mxu1 %v6325_v19  ;;  %5828 = vmatpush3.bf16.msra.mxu0 %v6325_v19  ;;  %v927_v29 = vand.u32 4294901760, %v926_v25 }
  0x51   :  { %5757 = vmatprep.subr.bf16.mxu1 %v6148_v11  ;;  %5835 = vmatprep.subr.bf16.mxu0 %v6148_v11  ;;  %v920_v28 = vand.u32 4294901760, %v919_v24 }
  0x52   :  { %5194 = vmatmul.mubr.f32.gmra.mrb[4].mxu0 %v6245_v38  ;;  %v6338_v38 = vpack.c.bf16 %v924_v21, %v917_v20 }
  0x53   :  { %5196 = vmatprep.mubr.f32.mxu0 %v6253_v44  ;;  %v6334_v32 = vpack.c.bf16 %v927_v29, %v920_v28 }
  0x56   :  { %5197 = vmatmul.mubr.f32.gmra.mrb[6].mxu0 %v6261_v51 }
  0x57   :  { %5339 = vmatprep.mubr.msk.f32.mxu0 %vm6149_vm1, %v6150_v16 }
  0xe4   :  { %v5109_v42 = vpop.f32.mrb[0].mxu1 }
  0xe5   :  { %v134_v43 = vpop.f32.mrb[1].mxu1  ;;  %v145_v51 = vadd.f32 %v5109_v42, %v4801_v50 }
  0xe6   :  { %v135_v52 = vadd.f32 %v4801_v50, %v134_v43 }
  0xe8   :  { %v5112_v44 = vpop.f32.mrb[2].mxu1 }
  0xe9   :  { %v154_v45 = vpop.f32.mrb[3].mxu1  ;;  %v165_v56 = vadd.f32 %v5112_v44, %v4801_v50 }
  0xea   :  { %v155_v58 = vadd.f32 %v4801_v50, %v154_v45 }
  0xf4   :  { %v5131_v46 = vpop.f32.mrb[4].mxu1 }
  0xf5   :  { %v309_v47 = vpop.f32.mrb[5].mxu1  ;;  %v6049_v62 = vadd.f32 %v5131_v46, %v4801_v50 }
  0xf6   :  { %v6051_v0 = vadd.f32 %v4801_v50, %v309_v47 }
  0xf8   :  { %v5134_v48 = vpop.f32.mrb[6].mxu1 }
  0xf9   :  { %v321_v49 = vpop.f32.mrb[7].mxu1  ;;  %v6053_v4 = vadd.f32 %v5134_v48, %v4801_v50 }
  0xfa   :  { %v6055_v6 = vadd.f32 %v4801_v50, %v321_v49 }
 0x11d   :  { %v5189_v53 = vpop.f32.mrb[0].mxu0 }
 0x11e   :  { %v6042_v54 = vadd.f32 %v5189_v53, %v145_v51  ;;  %v775_v55 = vpop.f32.mrb[1].mxu0 }
 0x11f   :  { %v6044_v57 = vadd.f32 %v775_v55, %v135_v52 }
 0x120   :  { %823 = vst.msk [vmem:[#allocation2 + $0x8] sm:$0xff] %vm821_vm2, %v6042_v54 }
 0x121   :  { %822 = vst.msk [vmem:[#allocation2] sm:$0xff] %vm821_vm2, %v6044_v57  ;;  %v5192_v59 = vpop.f32.mrb[2].mxu0 }
 0x122   :  { %v6046_v60 = vadd.f32 %v5192_v59, %v165_v56  ;;  %v787_v61 = vpop.f32.mrb[3].mxu0 }
 0x123   :  { %v6048_v63 = vadd.f32 %v787_v61, %v155_v58 }
 0x124   :  { %825 = vst.msk [vmem:[#allocation2 + $0x18] sm:$0xff] %vm821_vm2, %v6046_v60 }
 0x125   :  { %824 = vst.msk [vmem:[#allocation2 + $0x10] sm:$0xff] %vm821_vm2, %v6048_v63  ;;  %v5195_v1 = vpop.f32.mrb[4].mxu0 }
 0x126   :  { %v6050_v2 = vadd.f32 %v6049_v62, %v5195_v1  ;;  %v799_v3 = vpop.f32.mrb[5].mxu0 }
 0x127   :  { %v6052_v5 = vadd.f32 %v6051_v0, %v799_v3  ;;  %v832_v46 = vld [vmem:[#allocation2 + $0x8] sm:$0xff] }
 0x128   :  { %827 = vst.msk [vmem:[#allocation2 + $0x28] sm:$0xff] %vm821_vm2, %v6050_v2  ;;  %v830_v7 = vld [vmem:[#allocation2] sm:$0xff] }
 0x129   :  { %826 = vst.msk [vmem:[#allocation2 + $0x20] sm:$0xff] %vm821_vm2, %v6052_v5  ;;  %v5198_v8 = vpop.f32.mrb[6].mxu0  ;;  %6104 = vtanh.f32 %v830_v7 }
 0x12a   :  { %v6054_v9 = vadd.f32 %v6053_v4, %v5198_v8  ;;  %v811_v10 = vpop.f32.mrb[7].mxu0 }
 0x12b   :  { %v6056_v12 = vadd.f32 %v6055_v6, %v811_v10 }
 0x12c   :  { %829 = vst.msk [vmem:[#allocation2 + $0x38] sm:$0xff] %vm821_vm2, %v6054_v9  ;;  %v1323_v8 = vld [vmem:[#allocation2 + $0x10] sm:$0xff] }
 0x12d   :  { %828 = vst.msk [vmem:[#allocation2 + $0x30] sm:$0xff] %vm821_vm2, %v6056_v12 }
 0x133   :  { %v6105_v13 = vpop.eup %6104 }
 0x134   :  { %v834_v14 = vsel %vm821_vm2, %v6105_v13, 0 }
 0x135   :  { %v905_v15 = vand.u32 4294901760, %v834_v14 }
 0x137   :  { %v906_v17 = vsub.f32 %v834_v14, %v905_v15 }
 0x139   :  { %v907_v20 = vand.u32 4294901760, %v906_v17 }
 0x13b   :  { %v908_v21 = vsub.f32 %v906_v17, %v907_v20 }
 0x13d   :  { %v909_v22 = vand.u32 4294901760, %v908_v21 }
 0x13f   :  { %5208 = vmatmul.mubr.f32.vlgmr.msra.gmra.mrb[8].mxu1 %v909_v22 }
 0x140   :  { %5759 = vmatpush3.bf16.msra.mxu1 %v6334_v32  ;;  %5218 = vmatprep.mubr.msk.f32.mxu1 %vm6149_vm1, %v6150_v16 }
 0x141   :  { %5760 = vmatprep.subr.bf16.mxu1 %v6148_v11 }
 0x144   :  { %5762 = vmatpush3.bf16.msra.mxu1 %v6336_v37 }
 0x145   :  { %5763 = vmatprep.subr.bf16.mxu1 %v6148_v11 }
 0x147   :  { %5219 = vmatmul.mubr.f32.vlgmr.msra.gmra.mrb[10].mxu1 %v905_v15 }
 0x148   :  { %5765 = vmatpush3.bf16.msra.mxu1 %v6338_v38  ;;  %5229 = vmatprep.mubr.msk.f32.mxu1 %vm6149_vm1, %v6150_v16 }
 0x149   :  { %5766 = vmatprep.subr.bf16.mxu1 %v6148_v11 }
 0x14c   :  { %5768 = vmatpush3.bf16.msra.mxu1 %v6340_v39 }
 0x14d   :  { %5769 = vmatprep.subr.bf16.mxu1 %v6148_v11 }
 0x14f   :  { %5230 = vmatmul.mubr.f32.vlgmr.msra.gmra.mrb[12].mxu1 %v906_v17 }
 0x150   :  { %5771 = vmatpush3.bf16.msra.mxu1 %v6322_v18  ;;  %5240 = vmatprep.mubr.msk.f32.mxu1 %vm6149_vm1, %v6150_v16 }
 0x151   :  { %5772 = vmatprep.subr.bf16.mxu1 %v6148_v11 }
 0x154   :  { %5774 = vmatpush3.bf16.msra.mxu1 %v6325_v19 }
 0x155   :  { %5775 = vmatprep.subr.bf16.mxu1 %v6148_v11 }
 0x157   :  { %5241 = vmatmul.mubr.f32.vlgmr.msra.gmra.mrb[14].mxu1 %v907_v20 }
 0x158   :  { %5777 = vmatpush3.bf16.msra.mxu1 %v6342_v40  ;;  %5251 = vmatprep.mubr.msk.f32.mxu1 %vm6149_vm1, %v6150_v16 }
 0x159   :  { %5778 = vmatprep.subr.bf16.mxu1 %v6148_v11 }
 0x15c   :  { %5780 = vmatpush3.bf16.msra.mxu1 %v6344_v41 }
 0x15d   :  { %5781 = vmatprep.subr.bf16.mxu1 %v6148_v11 }
 0x15f   :  { %5252 = vmatmul.mubr.f32.vlgmr.msra.gmra.mrb[16].mxu1 %v905_v15 }
 0x160   :  { %5783 = vmatpush3.bf16.msra.mxu1 %v6322_v18  ;;  %5262 = vmatprep.mubr.msk.f32.mxu1 %vm6149_vm1, %v6150_v16 }
 0x161   :  { %5784 = vmatprep.subr.bf16.mxu1 %v6148_v11 }
 0x164   :  { %5786 = vmatpush3.bf16.msra.mxu1 %v6325_v19 }
 0x165   :  { %5787 = vmatprep.subr.bf16.mxu1 %v6148_v11 }
 0x167   :  { %5263 = vmatmul.mubr.f32.vlgmr.msra.gmra.mrb[18].mxu1 %v905_v15 }
 0x168   :  { %5789 = vmatpush3.bf16.msra.mxu1 %v6322_v18  ;;  %5273 = vmatprep.mubr.msk.f32.mxu1 %vm6149_vm1, %v6150_v16 }
 0x169   :  { %5790 = vmatprep.subr.bf16.mxu1 %v6148_v11 }
 0x16c   :  { %5792 = vmatpush3.bf16.msra.mxu1 %v6325_v19 }
 0x16d   :  { %5793 = vmatprep.subr.bf16.mxu1 %v6148_v11 }
 0x212   :  { %v911_v23 = vpop.f32.mrb[8].mxu1 }
 0x213   :  { %v5209_v24 = vpop.f32.mrb[9].mxu1 }
 0x21a   :  { %v1002_v25 = vpop.f32.mrb[10].mxu1 }
 0x21b   :  { %v1003_v26 = vadd.f32 %v1002_v25, %v911_v23  ;;  %v5220_v27 = vpop.f32.mrb[11].mxu1 }
 0x222   :  { %v1082_v28 = vpop.f32.mrb[12].mxu1 }
 0x223   :  { %v1083_v29 = vadd.f32 %v1082_v28, %v1003_v26  ;;  %v5231_v30 = vpop.f32.mrb[13].mxu1 }
 0x22a   :  { %v1159_v31 = vpop.f32.mrb[14].mxu1 }
 0x22b   :  { %v1160_v33 = vadd.f32 %v1159_v31, %v1083_v29  ;;  %v5242_v34 = vpop.f32.mrb[15].mxu1 }
 0x232   :  { %v1242_v35 = vpop.f32.mrb[16].mxu1 }
 0x233   :  { %v1243_v36 = vadd.f32 %v1242_v35, %v1160_v33  ;;  %v5253_v42 = vpop.f32.mrb[17].mxu1 }
 0x23a   :  { %v1317_v43 = vpop.f32.mrb[18].mxu1 }
 0x23b   :  { %v1318_v44 = vadd.f32 %v1317_v43, %v1243_v36  ;;  %v5264_v45 = vpop.f32.mrb[19].mxu1 }
 0x23d   :  { %v1321_v47 = vadd.f32 %v1318_v44, %v832_v46  ;;  %v1814_v44 = vld [vmem:[#allocation2 + $0x18] sm:$0xff] }
 0x23f   :  { %6106 = vtanh.f32 %v1321_v47 }
 0x249   :  { %v6107_v48 = vpop.eup %6106 }
 0x24a   :  { %v1325_v49 = vsel %vm821_vm2, %v6107_v48, 0 }
 0x24b   :  { %v1396_v50 = vand.u32 4294901760, %v1325_v49 }
 0x24d   :  { %v1397_v51 = vsub.f32 %v1325_v49, %v1396_v50 }
 0x24f   :  { %v1398_v52 = vand.u32 4294901760, %v1397_v51 }
 0x251   :  { %v1399_v53 = vsub.f32 %v1397_v51, %v1398_v52 }
 0x253   :  { %v1400_v54 = vand.u32 4294901760, %v1399_v53 }
 0x255   :  { %5274 = vmatmul.mubr.f32.vlgmr.msra.gmra.mrb[20].mxu1 %v1400_v54 }
 0x256   :  { %5795 = vmatpush3.bf16.msra.mxu1 %v6334_v32  ;;  %5284 = vmatprep.mubr.msk.f32.mxu1 %vm6149_vm1, %v6150_v16 }
 0x257   :  { %5796 = vmatprep.subr.bf16.mxu1 %v6148_v11 }
 0x25a   :  { %5798 = vmatpush3.bf16.msra.mxu1 %v6336_v37 }
 0x25b   :  { %5799 = vmatprep.subr.bf16.mxu1 %v6148_v11 }
 0x25d   :  { %5285 = vmatmul.mubr.f32.vlgmr.msra.gmra.mrb[22].mxu1 %v1396_v50 }
 0x25e   :  { %5801 = vmatpush3.bf16.msra.mxu1 %v6338_v38  ;;  %5295 = vmatprep.mubr.msk.f32.mxu1 %vm6149_vm1, %v6150_v16 }
 0x25f   :  { %5802 = vmatprep.subr.bf16.mxu1 %v6148_v11 }
 0x262   :  { %5804 = vmatpush3.bf16.msra.mxu1 %v6340_v39 }
 0x263   :  { %5805 = vmatprep.subr.bf16.mxu1 %v6148_v11 }
 0x265   :  { %5296 = vmatmul.mubr.f32.vlgmr.msra.gmra.mrb[24].mxu1 %v1397_v51 }
 0x266   :  { %5807 = vmatpush3.bf16.msra.mxu1 %v6322_v18  ;;  %5306 = vmatprep.mubr.msk.f32.mxu1 %vm6149_vm1, %v6150_v16 }
 0x267   :  { %5808 = vmatprep.subr.bf16.mxu1 %v6148_v11 }
 0x26a   :  { %5810 = vmatpush3.bf16.msra.mxu1 %v6325_v19 }
 0x26b   :  { %5811 = vmatprep.subr.bf16.mxu1 %v6148_v11 }
 0x26d   :  { %5307 = vmatmul.mubr.f32.vlgmr.msra.gmra.mrb[26].mxu1 %v1398_v52 }
 0x26e   :  { %5813 = vmatpush3.bf16.msra.mxu1 %v6342_v40  ;;  %5317 = vmatprep.mubr.msk.f32.mxu1 %vm6149_vm1, %v6150_v16 }
 0x26f   :  { %5814 = vmatprep.subr.bf16.mxu1 %v6148_v11 }
 0x272   :  { %5816 = vmatpush3.bf16.msra.mxu1 %v6344_v41 }
 0x273   :  { %5817 = vmatprep.subr.bf16.mxu1 %v6148_v11 }
 0x275   :  { %5318 = vmatmul.mubr.f32.vlgmr.msra.gmra.mrb[28].mxu1 %v1396_v50 }
 0x276   :  { %5819 = vmatpush3.bf16.msra.mxu1 %v6322_v18  ;;  %5328 = vmatprep.mubr.msk.f32.mxu1 %vm6149_vm1, %v6150_v16 }
 0x277   :  { %5820 = vmatprep.subr.bf16.mxu1 %v6148_v11 }
 0x27a   :  { %5822 = vmatpush3.bf16.msra.mxu1 %v6325_v19 }
 0x27b   :  { %5829 = vmatprep.subr.bf16.mxu1 %v6148_v11 }
 0x27d   :  { %5329 = vmatmul.mubr.f32.vlgmr.msra.gmra.mrb[30].mxu1 %v1396_v50 }
 0x27e   :  { %5831 = vmatpush3.bf16.msra.mxu1 %v6334_v32  ;;  %5350 = vmatprep.mubr.msk.f32.mxu1 %vm6149_vm1, %v6150_v16 }
 0x27f   :  { %5832 = vmatprep.subr.bf16.mxu1 %v6148_v11 }
 0x282   :  { %5834 = vmatpush3.bf16.msra.mxu1 %v6336_v37 }
 0x283   :  { %5841 = vmatprep.subr.bf16.mxu1 %v6148_v11 }
 0x328   :  { %v1402_v55 = vpop.f32.mrb[20].mxu1 }
 0x329   :  { %v5275_v56 = vpop.f32.mrb[21].mxu1 }
 0x330   :  { %v1493_v57 = vpop.f32.mrb[22].mxu1 }
 0x331   :  { %v1494_v58 = vadd.f32 %v1493_v57, %v1402_v55  ;;  %v5286_v59 = vpop.f32.mrb[23].mxu1 }
 0x338   :  { %v1573_v60 = vpop.f32.mrb[24].mxu1 }
 0x339   :  { %v1574_v61 = vadd.f32 %v1573_v60, %v1494_v58  ;;  %v5297_v62 = vpop.f32.mrb[25].mxu1 }
 0x340   :  { %v1650_v63 = vpop.f32.mrb[26].mxu1 }
 0x341   :  { %v1651_v0 = vadd.f32 %v1650_v63, %v1574_v61  ;;  %v5308_v1 = vpop.f32.mrb[27].mxu1 }
 0x348   :  { %v1733_v2 = vpop.f32.mrb[28].mxu1 }
 0x349   :  { %v1734_v3 = vadd.f32 %v1733_v2, %v1651_v0  ;;  %v5319_v4 = vpop.f32.mrb[29].mxu1 }
 0x350   :  { %v1808_v5 = vpop.f32.mrb[30].mxu1 }
 0x351   :  { %v1809_v6 = vadd.f32 %v1808_v5, %v1734_v3  ;;  %v5330_v7 = vpop.f32.mrb[31].mxu1 }
 0x353   :  { %v1812_v9 = vadd.f32 %v1809_v6, %v1323_v8  ;;  %v2305_v6 = vld [vmem:[#allocation2 + $0x20] sm:$0xff] }
 0x355   :  { %6108 = vtanh.f32 %v1812_v9 }
 0x35f   :  { %v6109_v10 = vpop.eup %6108 }
 0x360   :  { %v1816_v12 = vsel %vm821_vm2, %v6109_v10, 0 }
 0x361   :  { %v1887_v13 = vand.u32 4294901760, %v1816_v12 }
 0x363   :  { %v1888_v14 = vsub.f32 %v1816_v12, %v1887_v13  ;;  %5351 = vmatmul.mubr.f32.vlgmr.msra.gmra.mrb[32].mxu1 %v1887_v13 }
 0x364   :  { %5843 = vmatpush3.bf16.msra.mxu1 %v6322_v18  ;;  %5372 = vmatprep.mubr.msk.f32.mxu1 %vm6149_vm1, %v6150_v16 }
 0x365   :  { %5844 = vmatprep.subr.bf16.mxu1 %v6148_v11  ;;  %v1889_v15 = vand.u32 4294901760, %v1888_v14 }
 0x367   :  { %v1890_v17 = vsub.f32 %v1888_v14, %v1889_v15 }
 0x368   :  { %5846 = vmatpush3.bf16.msra.mxu1 %v6325_v19 }
 0x369   :  { %v1891_v20 = vand.u32 4294901760, %v1890_v17  ;;  %5853 = vmatprep.subr.bf16.mxu1 %v6148_v11 }
 0x36b   :  { %5373 = vmatmul.mubr.f32.vlgmr.msra.gmra.mrb[34].mxu1 %v1889_v15  ;;  %5340 = vmatmul.mubr.f32.vlgmr.msra.gmra.mrb[8].mxu0 %v1891_v20 }
 0x36c   :  { %5837 = vmatpush3.bf16.msra.mxu0 %v6338_v38  ;;  %5855 = vmatpush3.bf16.msra.mxu1 %v6322_v18 }
 0x36d   :  { %5838 = vmatprep.subr.bf16.mxu0 %v6148_v11  ;;  %5856 = vmatprep.subr.bf16.mxu1 %v6148_v11 }
 0x36e   :  { %5361 = vmatprep.mubr.msk.f32.mxu0 %vm6149_vm1, %v6150_v16  ;;  %5394 = vmatprep.mubr.msk.f32.mxu1 %vm6149_vm1, %v6150_v16 }
 0x370   :  { %5840 = vmatpush3.bf16.msra.mxu0 %v6340_v39  ;;  %5858 = vmatpush3.bf16.msra.mxu1 %v6325_v19 }
 0x371   :  { %5847 = vmatprep.subr.bf16.mxu0 %v6148_v11  ;;  %5865 = vmatprep.subr.bf16.mxu1 %v6148_v11 }
 0x373   :  { %5362 = vmatmul.mubr.f32.vlgmr.msra.gmra.mrb[10].mxu0 %v1888_v14  ;;  %5395 = vmatmul.mubr.f32.vlgmr.msra.gmra.mrb[36].mxu1 %v1887_v13 }
 0x374   :  { %5849 = vmatpush3.bf16.msra.mxu0 %v6342_v40  ;;  %5383 = vmatprep.mubr.msk.f32.mxu0 %vm6149_vm1, %v6150_v16 }
 0x375   :  { %5850 = vmatprep.subr.bf16.mxu0 %v6148_v11  ;;  %5867 = vmatpush3.bf16.msra.mxu1 %v6334_v32 }
 0x376   :  { %5868 = vmatprep.subr.bf16.mxu1 %v6148_v11  ;;  %5416 = vmatprep.mubr.msk.f32.mxu1 %vm6149_vm1, %v6150_v16 }
 0x378   :  { %5852 = vmatpush3.bf16.msra.mxu0 %v6344_v41 }
 0x379   :  { %5870 = vmatpush3.bf16.msra.mxu1 %v6336_v37  ;;  %5859 = vmatprep.subr.bf16.mxu0 %v6148_v11 }
 0x37a   :  { %5877 = vmatprep.subr.bf16.mxu1 %v6148_v11 }
 0x37b   :  { %5384 = vmatmul.mubr.f32.vlgmr.msra.gmra.mrb[12].mxu0 %v1887_v13 }
 0x37c   :  { %5861 = vmatpush3.bf16.msra.mxu0 %v6322_v18  ;;  %5405 = vmatprep.mubr.msk.f32.mxu0 %vm6149_vm1, %v6150_v16 }
 0x37d   :  { %5862 = vmatprep.subr.bf16.mxu0 %v6148_v11 }
 0x380   :  { %5864 = vmatpush3.bf16.msra.mxu0 %v6325_v19 }
 0x381   :  { %5871 = vmatprep.subr.bf16.mxu0 %v6148_v11 }
 0x436   :  { %v1984_v21 = vpop.f32.mrb[32].mxu1 }
 0x437   :  { %v5352_v22 = vpop.f32.mrb[33].mxu1 }
 0x43e   :  { %v2141_v23 = vpop.f32.mrb[34].mxu1  ;;  %v1893_v24 = vpop.f32.mrb[8].mxu0 }
 0x43f   :  { %v1985_v25 = vadd.f32 %v1984_v21, %v1893_v24  ;;  %v5374_v26 = vpop.f32.mrb[35].mxu1  ;;  %v5341_v27 = vpop.f32.mrb[9].mxu0 }
 0x446   :  { %v2064_v28 = vpop.f32.mrb[10].mxu0  ;;  %v2299_v29 = vpop.f32.mrb[36].mxu1 }
 0x447   :  { %v2065_v30 = vadd.f32 %v2064_v28, %v1985_v25  ;;  %v5363_v31 = vpop.f32.mrb[11].mxu0  ;;  %v5396_v33 = vpop.f32.mrb[37].mxu1 }
 0x449   :  { %v2142_v34 = vadd.f32 %v2141_v23, %v2065_v30 }
 0x44e   :  { %v2224_v35 = vpop.f32.mrb[12].mxu0 }
 0x44f   :  { %v2225_v36 = vadd.f32 %v2224_v35, %v2142_v34  ;;  %v5385_v42 = vpop.f32.mrb[13].mxu0 }
 0x450   :  { %v2796_v42 = vld [vmem:[#allocation2 + $0x28] sm:$0xff] }
 0x451   :  { %v2300_v43 = vadd.f32 %v2299_v29, %v2225_v36 }
 0x453   :  { %v2303_v45 = vadd.f32 %v2300_v43, %v1814_v44 }
 0x455   :  { %6110 = vtanh.f32 %v2303_v45 }
 0x45f   :  { %v6111_v46 = vpop.eup %6110 }
 0x460   :  { %v2307_v47 = vsel %vm821_vm2, %v6111_v46, 0 }
 0x461   :  { %v2378_v48 = vand.u32 4294901760, %v2307_v47 }
 0x463   :  { %v2379_v49 = vsub.f32 %v2307_v47, %v2378_v48  ;;  %5417 = vmatmul.mubr.f32.vlgmr.msra.gmra.mrb[38].mxu1 %v2378_v48 }
 0x464   :  { %5879 = vmatpush3.bf16.msra.mxu1 %v6322_v18  ;;  %5438 = vmatprep.mubr.msk.f32.mxu1 %vm6149_vm1, %v6150_v16 }
 0x465   :  { %5880 = vmatprep.subr.bf16.mxu1 %v6148_v11  ;;  %v2380_v50 = vand.u32 4294901760, %v2379_v49 }
 0x467   :  { %v2381_v51 = vsub.f32 %v2379_v49, %v2380_v50 }
 0x468   :  { %5882 = vmatpush3.bf16.msra.mxu1 %v6325_v19 }
 0x469   :  { %5889 = vmatprep.subr.bf16.mxu1 %v6148_v11  ;;  %v2382_v52 = vand.u32 4294901760, %v2381_v51 }
 0x46b   :  { %5439 = vmatmul.mubr.f32.vlgmr.msra.gmra.mrb[40].mxu1 %v2380_v50  ;;  %5406 = vmatmul.mubr.f32.vlgmr.msra.gmra.mrb[14].mxu0 %v2382_v52 }
 0x46c   :  { %5873 = vmatpush3.bf16.msra.mxu0 %v6338_v38  ;;  %5891 = vmatpush3.bf16.msra.mxu1 %v6322_v18 }
 0x46d   :  { %5874 = vmatprep.subr.bf16.mxu0 %v6148_v11  ;;  %5892 = vmatprep.subr.bf16.mxu1 %v6148_v11 }
 0x46e   :  { %5427 = vmatprep.mubr.msk.f32.mxu0 %vm6149_vm1, %v6150_v16  ;;  %5460 = vmatprep.mubr.msk.f32.mxu1 %vm6149_vm1, %v6150_v16 }
 0x470   :  { %5876 = vmatpush3.bf16.msra.mxu0 %v6340_v39  ;;  %5894 = vmatpush3.bf16.msra.mxu1 %v6325_v19 }
 0x471   :  { %5883 = vmatprep.subr.bf16.mxu0 %v6148_v11  ;;  %5901 = vmatprep.subr.bf16.mxu1 %v6148_v11 }
 0x473   :  { %5428 = vmatmul.mubr.f32.vlgmr.msra.gmra.mrb[16].mxu0 %v2379_v49  ;;  %5461 = vmatmul.mubr.f32.vlgmr.msra.gmra.mrb[42].mxu1 %v2378_v48 }
 0x474   :  { %5885 = vmatpush3.bf16.msra.mxu0 %v6342_v40  ;;  %5449 = vmatprep.mubr.msk.f32.mxu0 %vm6149_vm1, %v6150_v16 }
 0x475   :  { %5886 = vmatprep.subr.bf16.mxu0 %v6148_v11  ;;  %5903 = vmatpush3.bf16.msra.mxu1 %v6334_v32 }
 0x476   :  { %5904 = vmatprep.subr.bf16.mxu1 %v6148_v11  ;;  %5482 = vmatprep.mubr.msk.f32.mxu1 %vm6149_vm1, %v6150_v16 }
 0x478   :  { %5888 = vmatpush3.bf16.msra.mxu0 %v6344_v41 }
 0x479   :  { %5906 = vmatpush3.bf16.msra.mxu1 %v6336_v37  ;;  %5895 = vmatprep.subr.bf16.mxu0 %v6148_v11 }
 0x47a   :  { %5913 = vmatprep.subr.bf16.mxu1 %v6148_v11 }
 0x47b   :  { %5450 = vmatmul.mubr.f32.vlgmr.msra.gmra.mrb[18].mxu0 %v2378_v48 }
 0x47c   :  { %5897 = vmatpush3.bf16.msra.mxu0 %v6322_v18  ;;  %5471 = vmatprep.mubr.msk.f32.mxu0 %vm6149_vm1, %v6150_v16 }
 0x47d   :  { %5898 = vmatprep.subr.bf16.mxu0 %v6148_v11 }
 0x480   :  { %5900 = vmatpush3.bf16.msra.mxu0 %v6325_v19 }
 0x481   :  { %5907 = vmatprep.subr.bf16.mxu0 %v6148_v11 }
 0x536   :  { %v2475_v53 = vpop.f32.mrb[38].mxu1 }
 0x537   :  { %v5418_v54 = vpop.f32.mrb[39].mxu1 }
 0x53e   :  { %v2632_v55 = vpop.f32.mrb[40].mxu1  ;;  %v2384_v56 = vpop.f32.mrb[14].mxu0 }
 0x53f   :  { %v2476_v57 = vadd.f32 %v2475_v53, %v2384_v56  ;;  %v5440_v58 = vpop.f32.mrb[41].mxu1  ;;  %v5407_v59 = vpop.f32.mrb[15].mxu0 }
 0x546   :  { %v2555_v60 = vpop.f32.mrb[16].mxu0  ;;  %v2790_v61 = vpop.f32.mrb[42].mxu1 }
 0x547   :  { %v2556_v62 = vadd.f32 %v2555_v60, %v2476_v57  ;;  %v5429_v63 = vpop.f32.mrb[17].mxu0  ;;  %v5462_v0 = vpop.f32.mrb[43].mxu1 }
 0x549   :  { %v2633_v1 = vadd.f32 %v2632_v55, %v2556_v62 }
 0x54e   :  { %v2715_v2 = vpop.f32.mrb[18].mxu0 }
 0x54f   :  { %v2716_v3 = vadd.f32 %v2715_v2, %v2633_v1  ;;  %v5451_v4 = vpop.f32.mrb[19].mxu0  ;;  %v3287_v2 = vld [vmem:[#allocation2 + $0x30] sm:$0xff] }
 0x551   :  { %v2791_v5 = vadd.f32 %v2790_v61, %v2716_v3 }
 0x553   :  { %v2794_v7 = vadd.f32 %v2791_v5, %v2305_v6 }
 0x555   :  { %6112 = vtanh.f32 %v2794_v7 }
 0x55f   :  { %v6113_v8 = vpop.eup %6112 }
 0x560   :  { %v2798_v9 = vsel %vm821_vm2, %v6113_v8, 0 }
 0x561   :  { %v2869_v10 = vand.u32 4294901760, %v2798_v9 }
 0x563   :  { %v2870_v12 = vsub.f32 %v2798_v9, %v2869_v10  ;;  %5483 = vmatmul.mubr.f32.vlgmr.msra.gmra.mrb[44].mxu1 %v2869_v10 }
 0x564   :  { %5915 = vmatpush3.bf16.msra.mxu1 %v6322_v18  ;;  %5504 = vmatprep.mubr.msk.f32.mxu1 %vm6149_vm1, %v6150_v16 }
 0x565   :  { %5916 = vmatprep.subr.bf16.mxu1 %v6148_v11  ;;  %v2871_v13 = vand.u32 4294901760, %v2870_v12 }
 0x567   :  { %v2872_v14 = vsub.f32 %v2870_v12, %v2871_v13 }
 0x568   :  { %5918 = vmatpush3.bf16.msra.mxu1 %v6325_v19 }
 0x569   :  { %5925 = vmatprep.subr.bf16.mxu1 %v6148_v11  ;;  %v2873_v15 = vand.u32 4294901760, %v2872_v14 }
 0x56b   :  { %5505 = vmatmul.mubr.f32.vlgmr.msra.gmra.mrb[46].mxu1 %v2871_v13  ;;  %5472 = vmatmul.mubr.f32.vlgmr.msra.gmra.mrb[20].mxu0 %v2873_v15 }
 0x56c   :  { %5909 = vmatpush3.bf16.msra.mxu0 %v6338_v38  ;;  %5927 = vmatpush3.bf16.msra.mxu1 %v6322_v18 }
 0x56d   :  { %5910 = vmatprep.subr.bf16.mxu0 %v6148_v11  ;;  %5928 = vmatprep.subr.bf16.mxu1 %v6148_v11 }
 0x56e   :  { %5493 = vmatprep.mubr.msk.f32.mxu0 %vm6149_vm1, %v6150_v16  ;;  %5526 = vmatprep.mubr.msk.f32.mxu1 %vm6149_vm1, %v6150_v16 }
 0x570   :  { %5912 = vmatpush3.bf16.msra.mxu0 %v6340_v39  ;;  %5930 = vmatpush3.bf16.msra.mxu1 %v6325_v19 }
 0x571   :  { %5919 = vmatprep.subr.bf16.mxu0 %v6148_v11  ;;  %5937 = vmatprep.subr.bf16.mxu1 %v6148_v11 }
 0x573   :  { %5494 = vmatmul.mubr.f32.vlgmr.msra.gmra.mrb[22].mxu0 %v2870_v12  ;;  %5527 = vmatmul.mubr.f32.vlgmr.msra.gmra.mrb[48].mxu1 %v2869_v10 }
 0x574   :  { %5921 = vmatpush3.bf16.msra.mxu0 %v6342_v40  ;;  %5515 = vmatprep.mubr.msk.f32.mxu0 %vm6149_vm1, %v6150_v16 }
 0x575   :  { %5922 = vmatprep.subr.bf16.mxu0 %v6148_v11  ;;  %5939 = vmatpush3.bf16.msra.mxu1 %v6334_v32 }
 0x576   :  { %5940 = vmatprep.subr.bf16.mxu1 %v6148_v11  ;;  %5548 = vmatprep.mubr.msk.f32.mxu1 %vm6149_vm1, %v6150_v16 }
 0x578   :  { %5924 = vmatpush3.bf16.msra.mxu0 %v6344_v41 }
 0x579   :  { %5942 = vmatpush3.bf16.msra.mxu1 %v6336_v37  ;;  %5931 = vmatprep.subr.bf16.mxu0 %v6148_v11 }
 0x57a   :  { %5949 = vmatprep.subr.bf16.mxu1 %v6148_v11 }
 0x57b   :  { %5516 = vmatmul.mubr.f32.vlgmr.msra.gmra.mrb[24].mxu0 %v2869_v10 }
 0x57c   :  { %5933 = vmatpush3.bf16.msra.mxu0 %v6322_v18  ;;  %5537 = vmatprep.mubr.msk.f32.mxu0 %vm6149_vm1, %v6150_v16 }
 0x57d   :  { %5934 = vmatprep.subr.bf16.mxu0 %v6148_v11 }
 0x580   :  { %5936 = vmatpush3.bf16.msra.mxu0 %v6325_v19 }
 0x581   :  { %5943 = vmatprep.subr.bf16.mxu0 %v6148_v11 }
 0x636   :  { %v2966_v17 = vpop.f32.mrb[44].mxu1 }
 0x637   :  { %v5484_v20 = vpop.f32.mrb[45].mxu1 }
 0x63e   :  { %v3123_v21 = vpop.f32.mrb[46].mxu1  ;;  %v2875_v22 = vpop.f32.mrb[20].mxu0 }
 0x63f   :  { %v2967_v23 = vadd.f32 %v2966_v17, %v2875_v22  ;;  %v5506_v24 = vpop.f32.mrb[47].mxu1  ;;  %v5473_v25 = vpop.f32.mrb[21].mxu0 }
 0x646   :  { %v3046_v26 = vpop.f32.mrb[22].mxu0  ;;  %v3281_v27 = vpop.f32.mrb[48].mxu1 }
 0x647   :  { %v3047_v28 = vadd.f32 %v3046_v26, %v2967_v23  ;;  %v5495_v29 = vpop.f32.mrb[23].mxu0  ;;  %v5528_v30 = vpop.f32.mrb[49].mxu1 }
 0x649   :  { %v3124_v31 = vadd.f32 %v3123_v21, %v3047_v28 }
 0x64e   :  { %v3206_v33 = vpop.f32.mrb[24].mxu0 }
 0x64f   :  { %v3207_v34 = vadd.f32 %v3206_v33, %v3124_v31  ;;  %v5517_v35 = vpop.f32.mrb[25].mxu0 }
 0x651   :  { %v3282_v36 = vadd.f32 %v3281_v27, %v3207_v34 }
 0x653   :  { %v3285_v43 = vadd.f32 %v3282_v36, %v2796_v42 }
 0x655   :  { %6114 = vtanh.f32 %v3285_v43 }
 0x65f   :  { %v6115_v44 = vpop.eup %6114 }
 0x660   :  { %v3289_v45 = vsel %vm821_vm2, %v6115_v44, 0 }
 0x661   :  { %v3360_v46 = vand.u32 4294901760, %v3289_v45 }
 0x663   :  { %v3361_v47 = vsub.f32 %v3289_v45, %v3360_v46  ;;  %5549 = vmatmul.mubr.f32.vlgmr.msra.gmra.mrb[50].mxu1 %v3360_v46 }
 0x664   :  { %5951 = vmatpush3.bf16.msra.mxu1 %v6322_v18  ;;  %5570 = vmatprep.mubr.msk.f32.mxu1 %vm6149_vm1, %v6150_v16 }
 0x665   :  { %5952 = vmatprep.subr.bf16.mxu1 %v6148_v11  ;;  %v3362_v48 = vand.u32 4294901760, %v3361_v47 }
 0x667   :  { %v3363_v49 = vsub.f32 %v3361_v47, %v3362_v48 }
 0x668   :  { %5954 = vmatpush3.bf16.msra.mxu1 %v6325_v19 }
 0x669   :  { %5961 = vmatprep.subr.bf16.mxu1 %v6148_v11  ;;  %v3364_v50 = vand.u32 4294901760, %v3363_v49 }
 0x66b   :  { %5571 = vmatmul.mubr.f32.vlgmr.msra.gmra.mrb[52].mxu1 %v3362_v48  ;;  %5538 = vmatmul.mubr.f32.vlgmr.msra.gmra.mrb[26].mxu0 %v3364_v50 }
 0x66c   :  { %5945 = vmatpush3.bf16.msra.mxu0 %v6338_v38  ;;  %5963 = vmatpush3.bf16.msra.mxu1 %v6322_v18 }
 0x66d   :  { %5946 = vmatprep.subr.bf16.mxu0 %v6148_v11  ;;  %5964 = vmatprep.subr.bf16.mxu1 %v6148_v11 }
 0x66e   :  { %5559 = vmatprep.mubr.msk.f32.mxu0 %vm6149_vm1, %v6150_v16  ;;  %5592 = vmatprep.mubr.msk.f32.mxu1 %vm6149_vm1, %v6150_v16 }
 0x670   :  { %5948 = vmatpush3.bf16.msra.mxu0 %v6340_v39  ;;  %5966 = vmatpush3.bf16.msra.mxu1 %v6325_v19 }
 0x671   :  { %5955 = vmatprep.subr.bf16.mxu0 %v6148_v11  ;;  %5973 = vmatprep.subr.bf16.mxu1 %v6148_v11 }
 0x673   :  { %5560 = vmatmul.mubr.f32.vlgmr.msra.gmra.mrb[28].mxu0 %v3361_v47  ;;  %5593 = vmatmul.mubr.f32.vlgmr.msra.gmra.mrb[54].mxu1 %v3360_v46 }
 0x674   :  { %5957 = vmatpush3.bf16.msra.mxu0 %v6342_v40  ;;  %5581 = vmatprep.mubr.msk.f32.mxu0 %vm6149_vm1, %v6150_v16 }
 0x675   :  { %5958 = vmatprep.subr.bf16.mxu0 %v6148_v11  ;;  %5975 = vmatpush3.bf16.msra.mxu1 %v6334_v32 }
 0x676   :  { %5976 = vmatprep.subr.bf16.mxu1 %v6148_v11  ;;  %5614 = vmatprep.mubr.msk.f32.mxu1 %vm6149_vm1, %v6150_v16 }
 0x678   :  { %5960 = vmatpush3.bf16.msra.mxu0 %v6344_v41 }
 0x679   :  { %5978 = vmatpush3.bf16.msra.mxu1 %v6336_v37  ;;  %5967 = vmatprep.subr.bf16.mxu0 %v6148_v11 }
 0x67a   :  { %5985 = vmatprep.subr.bf16.mxu1 %v6148_v11 }
 0x67b   :  { %5582 = vmatmul.mubr.f32.vlgmr.msra.gmra.mrb[30].mxu0 %v3360_v46 }
 0x67c   :  { %5969 = vmatpush3.bf16.msra.mxu0 %v6322_v18  ;;  %5603 = vmatprep.mubr.msk.f32.mxu0 %vm6149_vm1, %v6150_v16 }
 0x67d   :  { %5970 = vmatprep.subr.bf16.mxu0 %v6148_v11 }
 0x680   :  { %5972 = vmatpush3.bf16.msra.mxu0 %v6325_v19 }
 0x681   :  { %5979 = vmatprep.subr.bf16.mxu0 %v6148_v11 }
 0x736   :  { %v3457_v32 = vpop.f32.mrb[50].mxu1 }
 0x737   :  { %v5550_v51 = vpop.f32.mrb[51].mxu1 }
 0x73e   :  { %v3614_v52 = vpop.f32.mrb[52].mxu1  ;;  %v3366_v37 = vpop.f32.mrb[26].mxu0 }
 0x73f   :  { %v3458_v53 = vadd.f32 %v3457_v32, %v3366_v37  ;;  %v5572_v54 = vpop.f32.mrb[53].mxu1  ;;  %v5539_v55 = vpop.f32.mrb[27].mxu0 }
 0x746   :  { %v3537_v56 = vpop.f32.mrb[28].mxu0  ;;  %v3772_v57 = vpop.f32.mrb[54].mxu1 }
 0x747   :  { %v3538_v58 = vadd.f32 %v3537_v56, %v3458_v53  ;;  %v5561_v59 = vpop.f32.mrb[29].mxu0  ;;  %v5594_v60 = vpop.f32.mrb[55].mxu1 }
 0x749   :  { %v3615_v61 = vadd.f32 %v3614_v52, %v3538_v58 }
 0x74e   :  { %v3697_v62 = vpop.f32.mrb[30].mxu0 }
 0x74f   :  { %v3698_v63 = vadd.f32 %v3697_v62, %v3615_v61  ;;  %v5583_v0 = vpop.f32.mrb[31].mxu0  ;;  %v3778_v62 = vld [vmem:[#allocation2 + $0x38] sm:$0xff] }
 0x751   :  { %v3773_v1 = vadd.f32 %v3772_v57, %v3698_v63 }
 0x753   :  { %v3776_v3 = vadd.f32 %v3773_v1, %v3287_v2 }
 0x755   :  { %6116 = vtanh.f32 %v3776_v3 }
 0x75f   :  { %v6117_v4 = vpop.eup %6116 }
 0x760   :  { %v3780_v5 = vsel %vm821_vm2, %v6117_v4, 0 }
 0x761   :  { %v3851_v6 = vand.u32 4294901760, %v3780_v5 }
 0x763   :  { %v3852_v7 = vsub.f32 %v3780_v5, %v3851_v6  ;;  %5615 = vmatmul.mubr.f32.vlgmr.msra.gmra.mrb[56].mxu1 %v3851_v6 }
 0x764   :  { %5987 = vmatpush3.bf16.msra.mxu1 %v6322_v18  ;;  %5636 = vmatprep.mubr.msk.f32.mxu1 %vm6149_vm1, %v6150_v16 }
 0x765   :  { %5988 = vmatprep.subr.bf16.mxu1 %v6148_v11  ;;  %v3853_v8 = vand.u32 4294901760, %v3852_v7 }
 0x767   :  { %v3854_v9 = vsub.f32 %v3852_v7, %v3853_v8 }
 0x768   :  { %5990 = vmatpush3.bf16.msra.mxu1 %v6325_v19 }
 0x769   :  { %5997 = vmatprep.subr.bf16.mxu1 %v6148_v11  ;;  %v3855_v10 = vand.u32 4294901760, %v3854_v9  ;;  %v4802_v9 = vld [vmem:[%s6668_s1 + $0x58] ss:$0 sm:$0xff] }
 0x76b   :  { %5637 = vmatmul.mubr.f32.vlgmr.msra.gmra.mrb[58].mxu1 %v3853_v8  ;;  %5604 = vmatmul.mubr.f32.vlgmr.msra.gmra.mrb[32].mxu0 %v3855_v10 }
 0x76c   :  { %5981 = vmatpush3.bf16.msra.mxu0 %v6338_v38  ;;  %5999 = vmatpush3.bf16.msra.mxu1 %v6322_v18  ;;  %v18_v18 = vld [vmem:[%s6668_s1 + $0x30] sm:$0xff]  ;;  %v20_v38 = vld [vmem:[%s6668_s1 + $0x40] sm:$0xff] }
 0x76d   :  { %5982 = vmatprep.subr.bf16.mxu0 %v6148_v11  ;;  %6000 = vmatprep.subr.bf16.mxu1 %v6148_v11  ;;  %v4283_v12 = vand.u32 4294901760, %v20_v38 }
 0x76e   :  { %5625 = vmatprep.mubr.msk.f32.mxu0 %vm6149_vm1, %v6150_v16  ;;  %5658 = vmatprep.mubr.msk.f32.mxu1 %vm6149_vm1, %v6150_v16 }
 0x76f   :  { %v4371_v20 = vsub.f32 %v20_v38, %v4283_v12 }
 0x770   :  { %5984 = vmatpush3.bf16.msra.mxu0 %v6340_v39  ;;  %6002 = vmatpush3.bf16.msra.mxu1 %v6325_v19  ;;  %v19_v19 = vld [vmem:[%s6668_s1 + $0x38] sm:$0xff]  ;;  %v4277_v39 = vand.u32 4294901760, %v18_v18 }
 0x771   :  { %5991 = vmatprep.subr.bf16.mxu0 %v6148_v11  ;;  %v4372_v29 = vand.u32 4294901760, %v4371_v20 }
 0x772   :  { %v4357_v15 = vsub.f32 %v18_v18, %v4277_v39 }
 0x773   :  { %5626 = vmatmul.mubr.f32.vlgmr.msra.gmra.mrb[34].mxu0 %v3852_v7  ;;  %5659 = vmatmul.mubr.f32.vlgmr.msra.gmra.mrb[60].mxu1 %v3851_v6  ;;  %v4373_v33 = vsub.f32 %v4371_v20, %v4372_v29  ;;  %v4761_v7 = vlaneseq }
 0x774   :  { %5993 = vmatpush3.bf16.msra.mxu0 %v6342_v40  ;;  %5647 = vmatprep.mubr.msk.f32.mxu0 %vm6149_vm1, %v6150_v16  ;;  %v4280_v40 = vand.u32 4294901760, %v19_v19  ;;  %v4358_v23 = vand.u32 4294901760, %v4357_v15 }
 0x775   :  { %5994 = vmatprep.subr.bf16.mxu0 %v6148_v11  ;;  %v4374_v35 = vand.u32 4294901760, %v4373_v33  ;;  %v4762_v8 = vshrl.u32 %v4761_v7, 7 }
 0x776   :  { %v6617_v14 = vpack.c.bf16 %v4280_v40, %v4277_v39  ;;  %v4364_v17 = vsub.f32 %v19_v19, %v4280_v40  ;;  %v4359_v25 = vsub.f32 %v4357_v15, %v4358_v23 }
 0x777   :  { %vm4763_vm3 = vcmp.lt.s32.totalorder %v4762_v8, 2 }
 0x778   :  { %5996 = vmatpush3.bf16.msra.mxu0 %v6344_v41  ;;  %v21_v41 = vld [vmem:[%s6668_s1 + $0x48] sm:$0xff]  ;;  %v4365_v24 = vand.u32 4294901760, %v4364_v17  ;;  %v4360_v27 = vand.u32 4294901760, %v4359_v25  ;;  %v6016_v43 = vpack.c.bf16 %v4364_v17, %v4357_v15  ;;  %s6151_s1 = smov [#allocation3]  }
 0x779   :  { %6003 = vmatprep.subr.bf16.mxu0 %v6148_v11  ;;  %v4286_v13 = vand.u32 4294901760, %v21_v41  ;;  %s4793_s20 = sshll.u32 %s6151_s1, 4  ;;  %s4794_s20 = int_to_ptr.vmem [resolvable:$true] %s4793_s20 }
 0x77a   :  { %v4366_v26 = vsub.f32 %v4364_v17, %v4365_v24  ;;  %v6028_v45 = vpack.c.bf16 %v4365_v24, %v4358_v23  ;;  %s6124_s21 = scalar_lea.vmem %s4794_s20, 128  ;;  %p6129_p1 = scmp.lt.s32.totalorder %s4794_s20, %s4794_s20 }
 0x77b   :  { %5648 = vmatmul.mubr.f32.vlgmr.msra.gmra.mrb[36].mxu0 %v3851_v6  ;;  %v4378_v21 = vsub.f32 %v21_v41, %v4286_v13  ;;  %v6620_v22 = vpack.c.bf16 %v4286_v13, %v4283_v12  ;;  %p6125_p0 = scmp.ne.s32.totalorder %s4794_s20, %s6124_s21  ;;  %p6130_p2 = scmp.lt.s32.totalorder %s6124_s21, %s6124_s21 }
 0x77c   :  { %5669 = vmatprep.mubr.msk.f32.mxu0 %vm6149_vm1, %v6150_v16  ;;  %6005 = vmatpush3.bf16.msra.mxu0 %v6617_v14  ;;  %v4367_v28 = vand.u32 4294901760, %v4366_v26 }
 0x77d   :  { %6006 = vmatprep.subr.bf16.mxu0 %v6148_v11  ;;  %v4379_v30 = vand.u32 4294901760, %v4378_v21  ;;  %v6019_v44 = vpack.c.bf16 %v4378_v21, %v4371_v20  ;;  %p6131_p3 = por %p6130_p2, %p6129_p1 }
 0x77e   :  { %v6010_v31 = vpack.c.bf16 %v4367_v28, %v4360_v27 }
 0x77f   :  { %v4380_v34 = vsub.f32 %v4378_v21, %v4379_v30  ;;  %v6031_v46 = vpack.c.bf16 %v4379_v30, %v4372_v29  ;;  %p6132_p4 = pnand %p6131_p3, %p6125_p0 }
 0x780   :  { %6008 = vmatpush3.bf16.msra.mxu0 %v6620_v22 }
 0x781   :  { %6009 = vmatprep.subr.bf16.mxu0 %v6148_v11  ;;  %v4381_v36 = vand.u32 4294901760, %v4380_v34 }
 0x783   :  { %v6013_v42 = vpack.c.bf16 %v4381_v36, %v4374_v35 }
 0x836   :  { %v3948_v47 = vpop.f32.mrb[56].mxu1 }
 0x837   :  { %v5616_v48 = vpop.f32.mrb[57].mxu1 }
 0x83e   :  { %v4105_v49 = vpop.f32.mrb[58].mxu1  ;;  %v3857_v50 = vpop.f32.mrb[32].mxu0 }
 0x83f   :  { %v3949_v32 = vadd.f32 %v3948_v47, %v3857_v50  ;;  %v5638_v51 = vpop.f32.mrb[59].mxu1  ;;  %v5605_v52 = vpop.f32.mrb[33].mxu0 }
 0x846   :  { %v4028_v37 = vpop.f32.mrb[34].mxu0  ;;  %v4263_v53 = vpop.f32.mrb[60].mxu1 }
 0x847   :  { %v4029_v54 = vadd.f32 %v4028_v37, %v3949_v32  ;;  %v5627_v55 = vpop.f32.mrb[35].mxu0  ;;  %v5660_v56 = vpop.f32.mrb[61].mxu1 }
 0x849   :  { %v4106_v57 = vadd.f32 %v4105_v49, %v4029_v54 }
 0x84e   :  { %v4188_v58 = vpop.f32.mrb[36].mxu0 }
 0x84f   :  { %v4189_v59 = vadd.f32 %v4188_v58, %v4106_v57  ;;  %v5649_v60 = vpop.f32.mrb[37].mxu0 }
 0x851   :  { %v4264_v61 = vadd.f32 %v4263_v53, %v4189_v59 }
 0x853   :  { %v4267_v63 = vadd.f32 %v4264_v61, %v3778_v62 }
 0x855   :  { %6118 = vtanh.f32 %v4267_v63 }
 0x85f   :  { %v6119_v0 = vpop.eup %6118 }
 0x860   :  { %v4274_v1 = vsel %vm821_vm2, %v6119_v0, 0 }
 0x861   :  { %v4345_v2 = vand.u32 4294901760, %v4274_v1 }
 0x863   :  { %v4346_v3 = vsub.f32 %v4274_v1, %v4345_v2 }
 0x865   :  { %v4347_v4 = vand.u32 4294901760, %v4346_v3 }
 0x867   :  { %v4348_v5 = vsub.f32 %v4346_v3, %v4347_v4 }
 0x869   :  { %v4349_v6 = vand.u32 4294901760, %v4348_v5 }
 0x86b   :  { %5670 = vmatmul.mubr.f32.vlgmr.msra.gmra.mrb[38].mxu0 %v4349_v6 }
 0x86c   :  { %6011 = vmatpush3.bf16.msra.mxu0 %v6010_v31  ;;  %5680 = vmatprep.mubr.msk.f32.mxu0 %vm6149_vm1, %v6150_v16 }
 0x86d   :  { %6012 = vmatprep.subr.bf16.mxu0 %v6148_v11 }
 0x870   :  { %6014 = vmatpush3.bf16.msra.mxu0 %v6013_v42 }
 0x871   :  { %6015 = vmatprep.subr.bf16.mxu0 %v6148_v11 }
 0x873   :  { %5681 = vmatmul.mubr.f32.vlgmr.msra.gmra.mrb[38].mxu0 %v4345_v2 }
 0x874   :  { %6017 = vmatpush3.bf16.msra.mxu0 %v6016_v43  ;;  %5691 = vmatprep.mubr.msk.f32.mxu0 %vm6149_vm1, %v6150_v16 }
 0x875   :  { %6018 = vmatprep.subr.bf16.mxu0 %v6148_v11 }
 0x878   :  { %6020 = vmatpush3.bf16.msra.mxu0 %v6019_v44 }
 0x879   :  { %6021 = vmatprep.subr.bf16.mxu0 %v6148_v11 }
 0x87b   :  { %5692 = vmatmul.mubr.f32.vlgmr.msra.gmra.mrb[38].mxu0 %v4346_v3 }
 0x87c   :  { %6023 = vmatpush3.bf16.msra.mxu0 %v6617_v14  ;;  %5702 = vmatprep.mubr.msk.f32.mxu0 %vm6149_vm1, %v6150_v16 }
 0x87d   :  { %6024 = vmatprep.subr.bf16.mxu0 %v6148_v11 }
 0x880   :  { %6026 = vmatpush3.bf16.msra.mxu0 %v6620_v22 }
 0x881   :  { %6027 = vmatprep.subr.bf16.mxu0 %v6148_v11 }
 0x883   :  { %5703 = vmatmul.mubr.f32.vlgmr.msra.gmra.mrb[38].mxu0 %v4347_v4 }
 0x884   :  { %6029 = vmatpush3.bf16.msra.mxu0 %v6028_v45  ;;  %5713 = vmatprep.mubr.msk.f32.mxu0 %vm6149_vm1, %v6150_v16 }
 0x885   :  { %6030 = vmatprep.subr.bf16.mxu0 %v6148_v11 }
 0x888   :  { %6032 = vmatpush3.bf16.msra.mxu0 %v6031_v46 }
 0x889   :  { %6033 = vmatprep.subr.bf16.mxu0 %v6148_v11 }
 0x88b   :  { %5714 = vmatmul.mubr.f32.vlgmr.msra.gmra.mrb[38].mxu0 %v4345_v2 }
 0x88c   :  { %6035 = vmatpush3.bf16.msra.mxu0 %v6617_v14  ;;  %5724 = vmatprep.mubr.msk.f32.mxu0 %vm6149_vm1, %v6150_v16 }
 0x88d   :  { %6036 = vmatprep.subr.bf16.mxu0 %v6148_v11 }
 0x890   :  { %6038 = vmatpush3.bf16.msra.mxu0 %v6620_v22 }
 0x893   :  { %5725 = vmatmul.mubr.f32.vlgmr.msra.gmra.mrb[38].mxu0 %v4345_v2 }
 0x966   :  { %v4757_v10 = vpop.f32.mrb[38].mxu0 }
 0x967   :  { %v6057_v18 = vadd.f32 %v4802_v9, %v4757_v10  ;;  %v5726_v19 = vpop.f32.mrb[39].mxu0 }
 0x969   :  { %v4764_v38 = vsel %vm4763_vm3, %v6057_v18, -1e+30 }
 0x96a   :  { %v4765_v39 = vsel %vm821_vm2, %v4764_v38, -inf }
 0x96b   :  { %v4766_v40 = vrot.slane %v4765_v39, 4 }
 0x96d   :  { %v4767_v16 = vmax.f32 %v4765_v39, %v4766_v40 }
 0x96f   :  { %v4768_v41 = vrot.slane %v4767_v16, 2 }
 0x971   :  { %v4769_v11 = vmax.f32 %v4767_v16, %v4768_v41 }
 0x973   :  { %v4770_v12 = vrot.slane %v4769_v11, 1 }
 0x975   :  { %v4771_v13 = vmax.f32 %v4769_v11, %v4770_v12 }
 0x977   :  { %v4772_v14 = vsub.f32 %v4764_v38, %v4771_v13  ;;  %v4782_v28 = vsub.f32 %v6057_v18, %v4771_v13 }
 0x979   :  { %v4773_v15 = vmul.f32 1.442695, %v4772_v14 }
 0x97b   :  { %6120 = vpow2.f32 %v4773_v15 }
 0x985   :  { %v6121_v17 = vpop.eup %6120 }
 0x986   :  { %v4775_v20 = vsel %vm821_vm2, %v6121_v17, 0.0 }
 0x987   :  { %v4776_v21 = vrot.slane %v4775_v20, 4 }
 0x989   :  { %v4777_v22 = vadd.f32 %v4776_v21, %v4775_v20 }
 0x98b   :  { %v4778_v23 = vrot.slane %v4777_v22, 2 }
 0x98d   :  { %v4779_v24 = vadd.f32 %v4778_v23, %v4777_v22 }
 0x98f   :  { %v4780_v25 = vrot.slane %v4779_v24, 1 }
 0x991   :  { %v4781_v26 = vadd.f32 %v4780_v25, %v4779_v24 }
 0x993   :  { %6122 = vlog2.f32 %v4781_v26 }
 0x99d   :  { %v6123_v27 = vpop.eup %6122 }
 0x99e   :  { %v4784_v29 = vmul.f32 0.6931472, %v6123_v27 }
 0x9a0   :  { %v4785_v30 = vsub.f32 %v4782_v28, %v4784_v29 }
 0x9a2   :  { %4786 = vst.msk [vmem:[#allocation3] sm:$0xff] %vm821_vm2, %v4785_v30 }
 0x9a3   :  { %6135 = shalt.err (!%p6132_p4)
}
 0x9a4   :  { %s6136_s24 = scalar_lea.hbm %s6669_s2, 128 }
 0x9a5   :  { %p6137_p5 = scmp.ne.s32.totalorder %s6669_s2, %s6136_s24  ;;  %p6140_p6 = scmp.lt.u32.totalorder %s6136_s24, %s6669_s2 }
 0x9a7   :  { %p6142_p7 = pnand %p6140_p6, %p6137_p5 }
 0x9a9   :  { %6145 = shalt.err (!%p6142_p7)
}
 0x9aa   :  { %4796 = dma.vmem_to_hbm [thread:$0]  %s4794_s20, 128, %s6669_s2, [#allocation4]  }
 0x9ab   :  { %6146 = dma.done.wait [#allocation4], 128  }
 0x9ac   :  { %6147 = vsyncadd [#allocation4], 4294967168 }
 0x9ad   :  { %4800 = vsyncpa [#allocation4], 1 }

</bundles_post_ra>
